<compile_context>
chip_gen: v7x
topology: tpu7x:2x2x1
jax: 0.10.0
libtpu: 0.0.40
codegen_flags: <defaults>
</compile_context>

<pallas_src>
import functools

import jax
import jax.numpy as jnp
from jax.experimental import pallas as pl
from jax.experimental.pallas import tpu as pltpu


def _bridge_attn_kernel(pt_ref, gs_ref,
                        wx_ref, wg_ref, b1_ref,
                        wa_ref, ba_ref,
                        o_ref, *, use_mxu):
    # Blocks are (1, C, T); index the leading size-1 batch dim away.
    pt = pt_ref[0]                         # (C, T)
    gs = gs_ref[0]                         # (C, T)
    C, T = pt.shape

    if use_mxu:
        # First stage: wx@pt + wg@gs with fused bias (bx + bg).
        s = (jnp.dot(wx_ref[...], pt, preferred_element_type=jnp.float32)
             + jnp.dot(wg_ref[...], gs, preferred_element_type=jnp.float32)
             + b1_ref[...])                # (C, T) + (C, 1) broadcast
        a = jnp.maximum(s, 0.0)            # ReLU
        t = jnp.tanh(jnp.dot(wa_ref[...], a, preferred_element_type=jnp.float32)
                     + ba_ref[...])
    else:
        # Small-C path: C broadcast-FMA passes on the VPU; avoids driving the
        # 128x128 / 256x256 MXU with a K=C degenerate contraction.
        wx = wx_ref[...]                   # (C, C)
        wg = wg_ref[...]
        wa = wa_ref[...]
        s = jnp.broadcast_to(b1_ref[...], (C, T))
        for i in range(C):                 # static unroll, C <= 32 here
            s = (s
                 + wx[:, i:i + 1] * pt[i:i + 1, :]
                 + wg[:, i:i + 1] * gs[i:i + 1, :])
        a = jnp.maximum(s, 0.0)
        t = jnp.broadcast_to(ba_ref[...], (C, T))
        for i in range(C):
            t = t + wa[:, i:i + 1] * a[i:i + 1, :]
        t = jnp.tanh(t)

    o_ref[0] = pt * (t + 1.0)


def _round_up(x, m):
    return ((x + m - 1) // m) * m


def _working_set_bytes(c_pad, tile_hw):
    """Per-grid-step VMEM estimate: 3 activation blocks x 2 pipeline buffers,
    ~3 f32 intermediates (s/a/t), double-buffered weights + biases."""
    act = (3 * 2 + 3) * c_pad * tile_hw * 4
    wts = 3 * c_pad * c_pad * 4 * 2
    bias = 2 * c_pad * 1 * 4 * 2
    return act + wts + bias


def _choose_tile_hw(hw_pad, c_pad, n_batch, budget_bytes):
    """Largest multiple of 128 dividing hw_pad whose working set fits the
    VMEM budget; halved once if the grid would otherwise have < 2 blocks."""
    per_col = (3 * 2 + 3) * c_pad * 4          # bytes per tile_hw column
    fixed = 3 * c_pad * c_pad * 4 * 2 + 2 * c_pad * 4 * 2
    avail = budget_bytes - fixed
    max_cols = max(128, avail // per_col)
    max_cols = (max_cols // 128) * 128
    cap = min(max_cols, hw_pad)

    best = 128
    t = 128
    while t <= cap:
        if hw_pad % t == 0:
            best = t
        t += 128
    tile = best

    # v7x has 2 TensorCores: make sure there are >= 2 grid blocks to shard.
    if n_batch * (hw_pad // tile) < 2 and tile % 256 == 0:
        tile //= 2
    return tile


def bridge_attention(pass_through, gating_signal, params, *,
                     vmem_budget_bytes=24 * 1024 * 1024):
    """pass_through/gating_signal: (N, C, H, W) float32. Returns (N, C, H, W)."""
    N, C, H, W = pass_through.shape
    HW = H * W
    C_pad = _round_up(C, 8)          # f32 sublane multiple
    HW_pad = _round_up(HW, 128)      # lane multiple -> unmasked stores

    wx, bx, wg, bg, wa, ba = params  # weights (C_out, C_in), biases (C,)

    if C_pad != C:
        dc = C_pad - C
        wx = jnp.pad(wx, ((0, dc), (0, dc)))
        wg = jnp.pad(wg, ((0, dc), (0, dc)))
        wa = jnp.pad(wa, ((0, dc), (0, dc)))
        bx = jnp.pad(bx, (0, dc))
        bg = jnp.pad(bg, (0, dc))
        ba = jnp.pad(ba, (0, dc))

    b1 = (bx + bg).reshape(C_pad, 1)          # fused first-stage bias
    ba2 = ba.reshape(C_pad, 1)

    # Free reshapes (contiguous): NCHW -> (N, C, H*W). No transposes anywhere.
    pt3 = pass_through.reshape(N, C, HW)
    gs3 = gating_signal.reshape(N, C, HW)
    if C_pad != C or HW_pad != HW:
        pad_cfg = ((0, 0), (0, C_pad - C), (0, HW_pad - HW))
        pt3 = jnp.pad(pt3, pad_cfg)
        gs3 = jnp.pad(gs3, pad_cfg)

    tile_hw = _choose_tile_hw(HW_pad, C_pad, N, vmem_budget_bytes)
    grid = (N, HW_pad // tile_hw)
    use_mxu = C_pad > 32

    ws = _working_set_bytes(C_pad, tile_hw)
    vmem_limit = int(min(max(ws * 5 // 4 + (4 << 20), 32 << 20), 56 << 20))

    blk_spec = pl.BlockSpec((1, C_pad, tile_hw), lambda n, j: (n, 0, j))
    w_spec = pl.BlockSpec((C_pad, C_pad), lambda n, j: (0, 0))
    b_spec = pl.BlockSpec((C_pad, 1), lambda n, j: (0, 0))

    out3 = pl.pallas_call(
        functools.partial(_bridge_attn_kernel, use_mxu=use_mxu),
        out_shape=jax.ShapeDtypeStruct((N, C_pad, HW_pad), jnp.float32),
        grid_spec=pltpu.PrefetchScalarGridSpec(
            num_scalar_prefetch=0,
            grid=grid,
            in_specs=[blk_spec, blk_spec,
                      w_spec, w_spec, b_spec,
                      w_spec, b_spec],
            out_specs=blk_spec,
        ),
        compiler_params=pltpu.CompilerParams(
            dimension_semantics=("parallel", "parallel"),
            vmem_limit_bytes=vmem_limit),
    )(pt3, gs3, wx, wg, b1, wa, ba2)

    return out3[:, :C, :HW].reshape(N, C, H, W)


def init_params(channels, key):
    """Deterministic init matching PyTorch Conv2d default (uniform +-1/sqrt(C))."""
    ks = jax.random.split(key, 6)
    scale = 1.0 / jnp.sqrt(channels)

    def conv_params(kw, kb):
        # PyTorch Conv2d weight is (C_out, C_in, 1, 1); keep (C_out, C_in).
        w = jax.random.uniform(kw, (channels, channels), jnp.float32, -scale, scale)
        b = jax.random.uniform(kb, (channels,), jnp.float32, -scale, scale)
        return w, b

    wx, bx = conv_params(ks[0], ks[1])
    wg, bg = conv_params(ks[2], ks[3])
    wa, ba = conv_params(ks[4], ks[5])
    return (wx, bx, wg, bg, wa, ba)


def _reference(pass_through, gating_signal, params):
    """Pure-JAX reference replicating the PyTorch forward (NCHW)."""
    wx, bx, wg, bg, wa, ba = params

    def conv1x1(x, w, b):
        return jnp.einsum('oc,nchw->nohw', w, x) + b[None, :, None, None]

    x = conv1x1(pass_through, wx, bx)
    g = conv1x1(gating_signal, wg, bg)
    t = jnp.tanh(conv1x1(jnp.maximum(x + g, 0.0), wa, ba))
    return pass_through * (t + 1.0)


if __name__ == "__main__":
    key = jax.random.PRNGKey(0)
    k_pt, k_gs, k_params = jax.random.split(key, 3)

    N, C, H, W = 2, 4, 16, 16
    pass_through = jax.random.normal(k_pt, (N, C, H, W), jnp.float32)
    gating_signal = jax.random.normal(k_gs, (N, C, H, W), jnp.float32)

    params = init_params(C, k_params)

    out = bridge_attention(pass_through, gating_signal, params)
    out = jax.block_until_ready(out)

    ref = _reference(pass_through, gating_signal, params)
    assert out.shape == (N, C, H, W)
    assert jnp.allclose(out, ref, atol=1e-5, rtol=1e-5), "mismatch vs reference"

    print("KERNEL_OK")
</pallas_src>

<mosaic_0001>
module attributes {stable_mosaic.version = 11 : i64} {
  func.func @_bridge_attn_kernel(%arg0: i32, %arg1: i32, %arg2: memref<1x8x256xf32, #tpu.memory_space<vmem>>, %arg3: memref<1x8x256xf32, #tpu.memory_space<vmem>>, %arg4: memref<8x8xf32, #tpu.memory_space<vmem>>, %arg5: memref<8x8xf32, #tpu.memory_space<vmem>>, %arg6: memref<8x1xf32, #tpu.memory_space<vmem>>, %arg7: memref<8x8xf32, #tpu.memory_space<vmem>>, %arg8: memref<8x1xf32, #tpu.memory_space<vmem>>, %arg9: memref<1x8x256xf32, #tpu.memory_space<vmem>>) attributes {dimension_semantics = [#tpu.dimension_semantics<parallel>, #tpu.dimension_semantics<parallel>], iteration_bounds = array<i64: 2, 1>, scalar_prefetch = 0 : i64, scratch_operands = 0 : i64, tpu.core_type = #tpu.core_type<tc>, window_params = [{transform_indices = @transform_0, window_bounds = array<i64: 1, 8, 256>}, {transform_indices = @transform_1, window_bounds = array<i64: 1, 8, 256>}, {pipeline_mode = #tpu.pipeline_mode<synchronous>, transform_indices = @transform_2, window_bounds = array<i64: 8, 8>}, {pipeline_mode = #tpu.pipeline_mode<synchronous>, transform_indices = @transform_3, window_bounds = array<i64: 8, 8>}, {pipeline_mode = #tpu.pipeline_mode<synchronous>, transform_indices = @transform_4, window_bounds = array<i64: 8, 1>}, {pipeline_mode = #tpu.pipeline_mode<synchronous>, transform_indices = @transform_5, window_bounds = array<i64: 8, 8>}, {pipeline_mode = #tpu.pipeline_mode<synchronous>, transform_indices = @transform_6, window_bounds = array<i64: 8, 1>}, {transform_indices = @transform_7, window_bounds = array<i64: 1, 8, 256>}]} {
    %c0 = arith.constant 0 : index
    %c0_0 = arith.constant 0 : index
    %c0_1 = arith.constant 0 : index
    %0 = vector.load %arg2[%c0, %c0_0, %c0_1] : memref<1x8x256xf32, #tpu.memory_space<vmem>>, vector<1x8x256xf32>
    %1 = vector.shape_cast %0 : vector<1x8x256xf32> to vector<8x256xf32>
    %c0_2 = arith.constant 0 : index
    %c0_3 = arith.constant 0 : index
    %c0_4 = arith.constant 0 : index
    %2 = vector.load %arg3[%c0_2, %c0_3, %c0_4] : memref<1x8x256xf32, #tpu.memory_space<vmem>>, vector<1x8x256xf32>
    %3 = vector.shape_cast %2 : vector<1x8x256xf32> to vector<8x256xf32>
    %c0_5 = arith.constant 0 : index
    %c0_6 = arith.constant 0 : index
    %4 = vector.load %arg4[%c0_5, %c0_6] : memref<8x8xf32, #tpu.memory_space<vmem>>, vector<8x8xf32>
    %c0_7 = arith.constant 0 : index
    %c0_8 = arith.constant 0 : index
    %5 = vector.load %arg5[%c0_7, %c0_8] : memref<8x8xf32, #tpu.memory_space<vmem>>, vector<8x8xf32>
    %c0_9 = arith.constant 0 : index
    %c0_10 = arith.constant 0 : index
    %6 = vector.load %arg7[%c0_9, %c0_10] : memref<8x8xf32, #tpu.memory_space<vmem>>, vector<8x8xf32>
    %c0_11 = arith.constant 0 : index
    %c0_12 = arith.constant 0 : index
    %7 = vector.load %arg6[%c0_11, %c0_12] : memref<8x1xf32, #tpu.memory_space<vmem>>, vector<8x1xf32>
    %8 = vector.shape_cast %7 : vector<8x1xf32> to vector<8x1xf32>
    %9 = vector.broadcast %8 : vector<8x1xf32> to vector<8x256xf32>
    %10 = vector.extract_strided_slice %4 {offsets = [0, 0], sizes = [8, 1], strides = [1, 1]} : vector<8x8xf32> to vector<8x1xf32>
    %11 = vector.extract_strided_slice %1 {offsets = [0, 0], sizes = [1, 256], strides = [1, 1]} : vector<8x256xf32> to vector<1x256xf32>
    %12 = vector.broadcast %10 : vector<8x1xf32> to vector<8x256xf32>
    %13 = vector.broadcast %11 : vector<1x256xf32> to vector<8x256xf32>
    %14 = arith.mulf %12, %13 : vector<8x256xf32>
    %15 = arith.addf %9, %14 : vector<8x256xf32>
    %16 = vector.extract_strided_slice %5 {offsets = [0, 0], sizes = [8, 1], strides = [1, 1]} : vector<8x8xf32> to vector<8x1xf32>
    %17 = vector.extract_strided_slice %3 {offsets = [0, 0], sizes = [1, 256], strides = [1, 1]} : vector<8x256xf32> to vector<1x256xf32>
    %18 = vector.broadcast %16 : vector<8x1xf32> to vector<8x256xf32>
    %19 = vector.broadcast %17 : vector<1x256xf32> to vector<8x256xf32>
    %20 = arith.mulf %18, %19 : vector<8x256xf32>
    %21 = arith.addf %15, %20 : vector<8x256xf32>
    %22 = vector.extract_strided_slice %4 {offsets = [0, 1], sizes = [8, 1], strides = [1, 1]} : vector<8x8xf32> to vector<8x1xf32>
    %23 = vector.extract_strided_slice %1 {offsets = [1, 0], sizes = [1, 256], strides = [1, 1]} : vector<8x256xf32> to vector<1x256xf32>
    %24 = vector.broadcast %22 : vector<8x1xf32> to vector<8x256xf32>
    %25 = vector.broadcast %23 : vector<1x256xf32> to vector<8x256xf32>
    %26 = arith.mulf %24, %25 : vector<8x256xf32>
    %27 = arith.addf %21, %26 : vector<8x256xf32>
    %28 = vector.extract_strided_slice %5 {offsets = [0, 1], sizes = [8, 1], strides = [1, 1]} : vector<8x8xf32> to vector<8x1xf32>
    %29 = vector.extract_strided_slice %3 {offsets = [1, 0], sizes = [1, 256], strides = [1, 1]} : vector<8x256xf32> to vector<1x256xf32>
    %30 = vector.broadcast %28 : vector<8x1xf32> to vector<8x256xf32>
    %31 = vector.broadcast %29 : vector<1x256xf32> to vector<8x256xf32>
    %32 = arith.mulf %30, %31 : vector<8x256xf32>
    %33 = arith.addf %27, %32 : vector<8x256xf32>
    %34 = vector.extract_strided_slice %4 {offsets = [0, 2], sizes = [8, 1], strides = [1, 1]} : vector<8x8xf32> to vector<8x1xf32>
    %35 = vector.extract_strided_slice %1 {offsets = [2, 0], sizes = [1, 256], strides = [1, 1]} : vector<8x256xf32> to vector<1x256xf32>
    %36 = vector.broadcast %34 : vector<8x1xf32> to vector<8x256xf32>
    %37 = vector.broadcast %35 : vector<1x256xf32> to vector<8x256xf32>
    %38 = arith.mulf %36, %37 : vector<8x256xf32>
    %39 = arith.addf %33, %38 : vector<8x256xf32>
    %40 = vector.extract_strided_slice %5 {offsets = [0, 2], sizes = [8, 1], strides = [1, 1]} : vector<8x8xf32> to vector<8x1xf32>
    %41 = vector.extract_strided_slice %3 {offsets = [2, 0], sizes = [1, 256], strides = [1, 1]} : vector<8x256xf32> to vector<1x256xf32>
    %42 = vector.broadcast %40 : vector<8x1xf32> to vector<8x256xf32>
    %43 = vector.broadcast %41 : vector<1x256xf32> to vector<8x256xf32>
    %44 = arith.mulf %42, %43 : vector<8x256xf32>
    %45 = arith.addf %39, %44 : vector<8x256xf32>
    %46 = vector.extract_strided_slice %4 {offsets = [0, 3], sizes = [8, 1], strides = [1, 1]} : vector<8x8xf32> to vector<8x1xf32>
    %47 = vector.extract_strided_slice %1 {offsets = [3, 0], sizes = [1, 256], strides = [1, 1]} : vector<8x256xf32> to vector<1x256xf32>
    %48 = vector.broadcast %46 : vector<8x1xf32> to vector<8x256xf32>
    %49 = vector.broadcast %47 : vector<1x256xf32> to vector<8x256xf32>
    %50 = arith.mulf %48, %49 : vector<8x256xf32>
    %51 = arith.addf %45, %50 : vector<8x256xf32>
    %52 = vector.extract_strided_slice %5 {offsets = [0, 3], sizes = [8, 1], strides = [1, 1]} : vector<8x8xf32> to vector<8x1xf32>
    %53 = vector.extract_strided_slice %3 {offsets = [3, 0], sizes = [1, 256], strides = [1, 1]} : vector<8x256xf32> to vector<1x256xf32>
    %54 = vector.broadcast %52 : vector<8x1xf32> to vector<8x256xf32>
    %55 = vector.broadcast %53 : vector<1x256xf32> to vector<8x256xf32>
    %56 = arith.mulf %54, %55 : vector<8x256xf32>
    %57 = arith.addf %51, %56 : vector<8x256xf32>
    %58 = vector.extract_strided_slice %4 {offsets = [0, 4], sizes = [8, 1], strides = [1, 1]} : vector<8x8xf32> to vector<8x1xf32>
    %59 = vector.extract_strided_slice %1 {offsets = [4, 0], sizes = [1, 256], strides = [1, 1]} : vector<8x256xf32> to vector<1x256xf32>
    %60 = vector.broadcast %58 : vector<8x1xf32> to vector<8x256xf32>
    %61 = vector.broadcast %59 : vector<1x256xf32> to vector<8x256xf32>
    %62 = arith.mulf %60, %61 : vector<8x256xf32>
    %63 = arith.addf %57, %62 : vector<8x256xf32>
    %64 = vector.extract_strided_slice %5 {offsets = [0, 4], sizes = [8, 1], strides = [1, 1]} : vector<8x8xf32> to vector<8x1xf32>
    %65 = vector.extract_strided_slice %3 {offsets = [4, 0], sizes = [1, 256], strides = [1, 1]} : vector<8x256xf32> to vector<1x256xf32>
    %66 = vector.broadcast %64 : vector<8x1xf32> to vector<8x256xf32>
    %67 = vector.broadcast %65 : vector<1x256xf32> to vector<8x256xf32>
    %68 = arith.mulf %66, %67 : vector<8x256xf32>
    %69 = arith.addf %63, %68 : vector<8x256xf32>
    %70 = vector.extract_strided_slice %4 {offsets = [0, 5], sizes = [8, 1], strides = [1, 1]} : vector<8x8xf32> to vector<8x1xf32>
    %71 = vector.extract_strided_slice %1 {offsets = [5, 0], sizes = [1, 256], strides = [1, 1]} : vector<8x256xf32> to vector<1x256xf32>
    %72 = vector.broadcast %70 : vector<8x1xf32> to vector<8x256xf32>
    %73 = vector.broadcast %71 : vector<1x256xf32> to vector<8x256xf32>
    %74 = arith.mulf %72, %73 : vector<8x256xf32>
    %75 = arith.addf %69, %74 : vector<8x256xf32>
    %76 = vector.extract_strided_slice %5 {offsets = [0, 5], sizes = [8, 1], strides = [1, 1]} : vector<8x8xf32> to vector<8x1xf32>
    %77 = vector.extract_strided_slice %3 {offsets = [5, 0], sizes = [1, 256], strides = [1, 1]} : vector<8x256xf32> to vector<1x256xf32>
    %78 = vector.broadcast %76 : vector<8x1xf32> to vector<8x256xf32>
    %79 = vector.broadcast %77 : vector<1x256xf32> to vector<8x256xf32>
    %80 = arith.mulf %78, %79 : vector<8x256xf32>
    %81 = arith.addf %75, %80 : vector<8x256xf32>
    %82 = vector.extract_strided_slice %4 {offsets = [0, 6], sizes = [8, 1], strides = [1, 1]} : vector<8x8xf32> to vector<8x1xf32>
    %83 = vector.extract_strided_slice %1 {offsets = [6, 0], sizes = [1, 256], strides = [1, 1]} : vector<8x256xf32> to vector<1x256xf32>
    %84 = vector.broadcast %82 : vector<8x1xf32> to vector<8x256xf32>
    %85 = vector.broadcast %83 : vector<1x256xf32> to vector<8x256xf32>
    %86 = arith.mulf %84, %85 : vector<8x256xf32>
    %87 = arith.addf %81, %86 : vector<8x256xf32>
    %88 = vector.extract_strided_slice %5 {offsets = [0, 6], sizes = [8, 1], strides = [1, 1]} : vector<8x8xf32> to vector<8x1xf32>
    %89 = vector.extract_strided_slice %3 {offsets = [6, 0], sizes = [1, 256], strides = [1, 1]} : vector<8x256xf32> to vector<1x256xf32>
    %90 = vector.broadcast %88 : vector<8x1xf32> to vector<8x256xf32>
    %91 = vector.broadcast %89 : vector<1x256xf32> to vector<8x256xf32>
    %92 = arith.mulf %90, %91 : vector<8x256xf32>
    %93 = arith.addf %87, %92 : vector<8x256xf32>
    %94 = vector.extract_strided_slice %4 {offsets = [0, 7], sizes = [8, 1], strides = [1, 1]} : vector<8x8xf32> to vector<8x1xf32>
    %95 = vector.extract_strided_slice %1 {offsets = [7, 0], sizes = [1, 256], strides = [1, 1]} : vector<8x256xf32> to vector<1x256xf32>
    %96 = vector.broadcast %94 : vector<8x1xf32> to vector<8x256xf32>
    %97 = vector.broadcast %95 : vector<1x256xf32> to vector<8x256xf32>
    %98 = arith.mulf %96, %97 : vector<8x256xf32>
    %99 = arith.addf %93, %98 : vector<8x256xf32>
    %100 = vector.extract_strided_slice %5 {offsets = [0, 7], sizes = [8, 1], strides = [1, 1]} : vector<8x8xf32> to vector<8x1xf32>
    %101 = vector.extract_strided_slice %3 {offsets = [7, 0], sizes = [1, 256], strides = [1, 1]} : vector<8x256xf32> to vector<1x256xf32>
    %102 = vector.broadcast %100 : vector<8x1xf32> to vector<8x256xf32>
    %103 = vector.broadcast %101 : vector<1x256xf32> to vector<8x256xf32>
    %104 = arith.mulf %102, %103 : vector<8x256xf32>
    %105 = arith.addf %99, %104 : vector<8x256xf32>
    %cst = arith.constant 0.000000e+00 : f32
    %106 = vector.broadcast %cst : f32 to vector<8x256xf32>
    %107 = arith.maximumf %105, %106 : vector<8x256xf32>
    %c0_13 = arith.constant 0 : index
    %c0_14 = arith.constant 0 : index
    %108 = vector.load %arg8[%c0_13, %c0_14] : memref<8x1xf32, #tpu.memory_space<vmem>>, vector<8x1xf32>
    %109 = vector.shape_cast %108 : vector<8x1xf32> to vector<8x1xf32>
    %110 = vector.broadcast %109 : vector<8x1xf32> to vector<8x256xf32>
    %111 = vector.extract_strided_slice %6 {offsets = [0, 0], sizes = [8, 1], strides = [1, 1]} : vector<8x8xf32> to vector<8x1xf32>
    %112 = vector.extract_strided_slice %107 {offsets = [0, 0], sizes = [1, 256], strides = [1, 1]} : vector<8x256xf32> to vector<1x256xf32>
    %113 = vector.broadcast %111 : vector<8x1xf32> to vector<8x256xf32>
    %114 = vector.broadcast %112 : vector<1x256xf32> to vector<8x256xf32>
    %115 = arith.mulf %113, %114 : vector<8x256xf32>
    %116 = arith.addf %110, %115 : vector<8x256xf32>
    %117 = vector.extract_strided_slice %6 {offsets = [0, 1], sizes = [8, 1], strides = [1, 1]} : vector<8x8xf32> to vector<8x1xf32>
    %118 = vector.extract_strided_slice %107 {offsets = [1, 0], sizes = [1, 256], strides = [1, 1]} : vector<8x256xf32> to vector<1x256xf32>
    %119 = vector.broadcast %117 : vector<8x1xf32> to vector<8x256xf32>
    %120 = vector.broadcast %118 : vector<1x256xf32> to vector<8x256xf32>
    %121 = arith.mulf %119, %120 : vector<8x256xf32>
    %122 = arith.addf %116, %121 : vector<8x256xf32>
    %123 = vector.extract_strided_slice %6 {offsets = [0, 2], sizes = [8, 1], strides = [1, 1]} : vector<8x8xf32> to vector<8x1xf32>
    %124 = vector.extract_strided_slice %107 {offsets = [2, 0], sizes = [1, 256], strides = [1, 1]} : vector<8x256xf32> to vector<1x256xf32>
    %125 = vector.broadcast %123 : vector<8x1xf32> to vector<8x256xf32>
    %126 = vector.broadcast %124 : vector<1x256xf32> to vector<8x256xf32>
    %127 = arith.mulf %125, %126 : vector<8x256xf32>
    %128 = arith.addf %122, %127 : vector<8x256xf32>
    %129 = vector.extract_strided_slice %6 {offsets = [0, 3], sizes = [8, 1], strides = [1, 1]} : vector<8x8xf32> to vector<8x1xf32>
    %130 = vector.extract_strided_slice %107 {offsets = [3, 0], sizes = [1, 256], strides = [1, 1]} : vector<8x256xf32> to vector<1x256xf32>
    %131 = vector.broadcast %129 : vector<8x1xf32> to vector<8x256xf32>
    %132 = vector.broadcast %130 : vector<1x256xf32> to vector<8x256xf32>
    %133 = arith.mulf %131, %132 : vector<8x256xf32>
    %134 = arith.addf %128, %133 : vector<8x256xf32>
    %135 = vector.extract_strided_slice %6 {offsets = [0, 4], sizes = [8, 1], strides = [1, 1]} : vector<8x8xf32> to vector<8x1xf32>
    %136 = vector.extract_strided_slice %107 {offsets = [4, 0], sizes = [1, 256], strides = [1, 1]} : vector<8x256xf32> to vector<1x256xf32>
    %137 = vector.broadcast %135 : vector<8x1xf32> to vector<8x256xf32>
    %138 = vector.broadcast %136 : vector<1x256xf32> to vector<8x256xf32>
    %139 = arith.mulf %137, %138 : vector<8x256xf32>
    %140 = arith.addf %134, %139 : vector<8x256xf32>
    %141 = vector.extract_strided_slice %6 {offsets = [0, 5], sizes = [8, 1], strides = [1, 1]} : vector<8x8xf32> to vector<8x1xf32>
    %142 = vector.extract_strided_slice %107 {offsets = [5, 0], sizes = [1, 256], strides = [1, 1]} : vector<8x256xf32> to vector<1x256xf32>
    %143 = vector.broadcast %141 : vector<8x1xf32> to vector<8x256xf32>
    %144 = vector.broadcast %142 : vector<1x256xf32> to vector<8x256xf32>
    %145 = arith.mulf %143, %144 : vector<8x256xf32>
    %146 = arith.addf %140, %145 : vector<8x256xf32>
    %147 = vector.extract_strided_slice %6 {offsets = [0, 6], sizes = [8, 1], strides = [1, 1]} : vector<8x8xf32> to vector<8x1xf32>
    %148 = vector.extract_strided_slice %107 {offsets = [6, 0], sizes = [1, 256], strides = [1, 1]} : vector<8x256xf32> to vector<1x256xf32>
    %149 = vector.broadcast %147 : vector<8x1xf32> to vector<8x256xf32>
    %150 = vector.broadcast %148 : vector<1x256xf32> to vector<8x256xf32>
    %151 = arith.mulf %149, %150 : vector<8x256xf32>
    %152 = arith.addf %146, %151 : vector<8x256xf32>
    %153 = vector.extract_strided_slice %6 {offsets = [0, 7], sizes = [8, 1], strides = [1, 1]} : vector<8x8xf32> to vector<8x1xf32>
    %154 = vector.extract_strided_slice %107 {offsets = [7, 0], sizes = [1, 256], strides = [1, 1]} : vector<8x256xf32> to vector<1x256xf32>
    %155 = vector.broadcast %153 : vector<8x1xf32> to vector<8x256xf32>
    %156 = vector.broadcast %154 : vector<1x256xf32> to vector<8x256xf32>
    %157 = arith.mulf %155, %156 : vector<8x256xf32>
    %158 = arith.addf %152, %157 : vector<8x256xf32>
    %159 = math.tanh %158 : vector<8x256xf32>
    %cst_15 = arith.constant 1.000000e+00 : f32
    %160 = vector.broadcast %cst_15 : f32 to vector<8x256xf32>
    %161 = arith.addf %159, %160 : vector<8x256xf32>
    %162 = arith.mulf %1, %161 : vector<8x256xf32>
    %c0_16 = arith.constant 0 : index
    %c0_17 = arith.constant 0 : index
    %c0_18 = arith.constant 0 : index
    %163 = vector.load %arg9[%c0_16, %c0_17, %c0_18] : memref<1x8x256xf32, #tpu.memory_space<vmem>>, vector<1x8x256xf32>
    %164 = vector.shape_cast %163 : vector<1x8x256xf32> to vector<8x256xf32>
    %165 = vector.shape_cast %162 : vector<8x256xf32> to vector<1x8x256xf32>
    tpu.vector_store %arg9[%c0_16, %c0_17, %c0_18], %165 {strides = array<i32>} : memref<1x8x256xf32, #tpu.memory_space<vmem>>, vector<1x8x256xf32>,
    return
  }
  func.func @transform_0(%arg0: i32, %arg1: i32) -> (i32, i32, i32) {
    %c0_i32 = arith.constant 0 : i32
    %c0_i32_0 = arith.constant 0 : i32
    return %arg0, %c0_i32, %arg1 : i32, i32, i32
  }
  func.func @transform_1(%arg0: i32, %arg1: i32) -> (i32, i32, i32) {
    %c0_i32 = arith.constant 0 : i32
    %c0_i32_0 = arith.constant 0 : i32
    return %arg0, %c0_i32, %arg1 : i32, i32, i32
  }
  func.func @transform_2(%arg0: i32, %arg1: i32) -> (i32, i32) {
    %c0_i32 = arith.constant 0 : i32
    %c0_i32_0 = arith.constant 0 : i32
    %c0_i32_1 = arith.constant 0 : i32
    return %c0_i32, %c0_i32_0 : i32, i32
  }
  func.func @transform_3(%arg0: i32, %arg1: i32) -> (i32, i32) {
    %c0_i32 = arith.constant 0 : i32
    %c0_i32_0 = arith.constant 0 : i32
    %c0_i32_1 = arith.constant 0 : i32
    return %c0_i32, %c0_i32_0 : i32, i32
  }
  func.func @transform_4(%arg0: i32, %arg1: i32) -> (i32, i32) {
    %c0_i32 = arith.constant 0 : i32
    %c0_i32_0 = arith.constant 0 : i32
    %c0_i32_1 = arith.constant 0 : i32
    return %c0_i32, %c0_i32_0 : i32, i32
  }
  func.func @transform_5(%arg0: i32, %arg1: i32) -> (i32, i32) {
    %c0_i32 = arith.constant 0 : i32
    %c0_i32_0 = arith.constant 0 : i32
    %c0_i32_1 = arith.constant 0 : i32
    return %c0_i32, %c0_i32_0 : i32, i32
  }
  func.func @transform_6(%arg0: i32, %arg1: i32) -> (i32, i32) {
    %c0_i32 = arith.constant 0 : i32
    %c0_i32_0 = arith.constant 0 : i32
    %c0_i32_1 = arith.constant 0 : i32
    return %c0_i32, %c0_i32_0 : i32, i32
  }
  func.func @transform_7(%arg0: i32, %arg1: i32) -> (i32, i32, i32) {
    %c0_i32 = arith.constant 0 : i32
    %c0_i32_0 = arith.constant 0 : i32
    return %arg0, %c0_i32, %arg1 : i32, i32, i32
  }
}

</mosaic_0001>

<bundles_post_ra>
// kernel: tpu_custom_call.1
= control target key start
LH: loop header
LB: loop body
LE: loop exit
PB: predicated region body
PF: predicated region fallthrough
CT: control target
= control target key end

     0   :  { %s1587_s0 = inlined_call_operand.hbm [shape: f32[2,8,256], index: 0, kind: input, shape index: {}]   ;;  %s1588_s1 = inlined_call_operand.hbm [shape: f32[2,8,256], index: 1, kind: input, shape index: {}]   ;;  %s1589_s2 = inlined_call_operand.vmem [shape: f32[8,8], index: 2, kind: input, shape index: {}]   ;;  %s1590_s3 = inlined_call_operand.vmem [shape: f32[8,8], index: 3, kind: input, shape index: {}]   ;;  %s1591_s4 = inlined_call_operand.vmem [shape: f32[8,1], index: 4, kind: input, shape index: {}]   ;;  %s1592_s5 = inlined_call_operand.vmem [shape: f32[8,8], index: 5, kind: input, shape index: {}]   ;;  %s1593_s6 = inlined_call_operand.vmem [shape: f32[8,1], index: 6, kind: input, shape index: {}]   ;;  %s1594_s7 = inlined_call_operand.hbm [shape: f32[2,8,256], index: 7, kind: output, shape index: {}]  }
   0x1   :  { %1600 = sst [smem:[#allocation12_spill]] %s1587_s0 }
   0x2   :  { %12 = vsyncpa [#allocation3], 0 }
   0x3   :  { %14 = vsyncpa [#allocation3 + $0x1], 0 }
   0x4   :  { %15 = vsyncpa [#allocation6], 0 }
   0x5   :  { %17 = vsyncpa [#allocation6 + $0x1], 0 }
   0x6   :  { %18 = vsyncpa [#allocation4], 0 }
   0x7   :  { %20 = vsyncpa [#allocation4 + $0x1], 0  ;;  %s1223_s24 = smov 0   ;;  %s1225_s25 = smov 0  }
   0x8   :  { %s1227_s26 = smov 0   ;;  %s1229_s27 = smov 0  }
   0x9   :  { %s1231_s28 = smov 0   ;;  %s1233_s29 = smov 0  }
   0xa LB: > { %s901_s30 = sadd.s32 4294967295, %s1170_s29   ;;  %s902_s8 = sadd.s32 4294967294, %s1170_s29   ;;  %s1170_s29 = sphi %s1233_s29, %s26_s29   ;;  %s1166_s28 = sphi %s1231_s28, %s1623_s28   ;;  %s1162_s27 = sphi %s1229_s27, %s1622_s27   ;;  %s1158_s26 = sphi %s1227_s26, %s1621_s26   ;;  %s1154_s25 = sphi %s1225_s25, %s1620_s25   ;;  %s1150_s24 = sphi %s1223_s24, %s1619_s24  }
   0xb   : > { %s38_s9 = sadd.s32 1, %s1166_s28  ;;  %s47_s10 = sadd.s32 1, %s1158_s26 }
   0xc   : > { %p40_p0 = scmp.ge.s32.totalorder %s38_s9, 2  ;;  %p54_p1 = scmp.ne.s32.totalorder %s1158_s26, %s1154_s25 }
   0xd   : > { %p55_p2 = scmp.eq.s32.totalorder %s1170_s29, 0  ;;  %p60_p3 = scmp.ne.s32.totalorder %s1154_s25, %s1150_s24 }
   0xe   : > { %s1625_s9 = smov (%p40_p0, %s38_s9), 0  ;;  %p61_p5 = scmp.eq.s32.totalorder %s901_s30, 0 }
   0xf   : > { %1601 = sst [smem:[#allocation11_spill]] %s1625_s9  ;;  %p1264_p4 = por %p55_p2, %p54_p1 }
  0x10   : > { %s42_s12 = ssub.s32 %s1166_s28, %s1625_s9  ;;  %p219_p6 = scmp.eq.s32.totalorder %s901_s30, 1 }
  0x11   : > { %p45_p7 = scmp.eq.s32.totalorder %s42_s12, 0  ;;  %p1270_p8 = por %p61_p5, %p60_p3 }
  0x12   : > { %p1274_p9 = por %p219_p6, %p54_p1  ;;  %p225_p10 = scmp.eq.s32.totalorder %s902_s8, 1 }
  0x13   : > { %s1603_s13 = scalar_select %p1270_p8, 1, 0 }
  0x14   : > { %s1604_s14 = scalar_select %p1274_p9, 1, 0 }
  0x15   : > { %s1279_s15 = scalar_select %p45_p7, %s1158_s26, %s47_s10  }
  0x16   : > { %p1281_p11 = por %p225_p10, %p60_p3  ;;  %p940_p13 = scmp.lt.s32.totalorder %s1170_s29, 2 }
  0x17   : > { %s1288_s17 = sand.u32 1, %s1158_s26   ;;  %s1596_s19 = sshll.u32 %s1166_s28, 8 }
  0x18   : > { %s1605_s16 = scalar_select %p1281_p11, 1, 0 }
  0x19   : > { %s1595_s18 = sshll.u32 %s1288_s17, 4  ;;  %s1606_s0 = sld [smem:[#allocation12_spill]] }
  0x1a   : > { %s264_s23 = scalar_lea.vmem [#allocation2], %s1595_s18  ;;  %p1305_p0 = pnand %p940_p13, %p1264_p4 }
  0x1b   : > { %s274_s30 = sshll.u32 %s264_s23, 4  ;;  %s261_s10 = scalar_lea.sflag [#allocation3], %s1288_s17  ;;  %s1301_s30 = int_to_ptr.vmem [resolvable:$true] %s274_s30 }
  0x1c   : > { %p1026_p5 = pneg %p1305_p0 }
  0x1f   : > { %s1297_s22 = scalar_lea.hbm %s1606_s0, %s1596_s19  ;;  %s1029_s11 = scalar_lea.hbm %s1606_s0, 512 }
  0x20   : > { %s1024_s12 = scalar_lea.hbm %s1297_s22, 256  ;;  %p1030_p4 = scmp.lt.u32.totalorder %s1297_s22, %s1606_s0 }
  0x21   : > { %p1025_p3 = scmp.ne.s32.totalorder %s1297_s22, %s1024_s12  ;;  %p1031_p10 = scmp.lt.u32.totalorder %s1029_s11, %s1024_s12 }
  0x22   : > { %p1033_p12 = scmp.lt.u32.totalorder %s1024_s12, %s1297_s22 }
  0x23   : > { %p1027_p6 = pnand %p1026_p5, %p1025_p3  ;;  %p1032_p13 = por %p1031_p10, %p1030_p4 }
  0x25   : > { %p1028_p7 = pneg %p1027_p6  ;;  %p1034_p1 = por %p1033_p12, %p1032_p13 }
  0x27   : > { %p1035_p2 = pnand %p1034_p1, %p1028_p7 }
  0x29   : > { %1038 = shalt.err (!%p1035_p2)
}
  0x2a   : > { %s1039_s19 = scalar_lea.vmem %s1301_s30, 256  ;;  %s1172_s20 = smov [#allocation2]  }
  0x2b   : > { %p1040_p3 = scmp.ne.s32.totalorder %s1301_s30, %s1039_s19  ;;  %s1044_s21 = sshll.u32 %s1172_s20, 4  ;;  %s1045_s21 = int_to_ptr.vmem [resolvable:$false] %s1044_s21 }
  0x2c   : > { %s1046_s18 = scalar_lea.vmem %s1045_s21, 512  ;;  %p1047_p9 = scmp.lt.s32.totalorder %s1301_s30, %s1045_s21 }
  0x2d   : > { %p1042_p6 = pnand %p1040_p3, %p1026_p5  ;;  %p1048_p4 = scmp.lt.s32.totalorder %s1046_s18, %s1039_s19 }
  0x2f   : > { %p1043_p11 = pneg %p1042_p6  ;;  %p1049_p10 = por %p1048_p4, %p1047_p9 }
  0x31   : > { %p1050_p12 = pnand %p1049_p10, %p1043_p11 }
  0x33   : > { %1053 = shalt.err (!%p1050_p12)
}
  0x34   : > { %932 = dma.hbm_to_vmem [thread:$0]  (!%p1305_p0), %s1297_s22, 256, %s1301_s30, %s261_s10  }
  0x35   : > { %p1608_p1 = scmp.lt.s32.totalorder %s1170_s29, 3  ;;  %p1609_p2 = scmp.ge.s32.totalorder %s1170_s29, 1 }
  0x36   : > { %s1611_s19 = sshll.u32 %s1166_s28, 8  ;;  %s1612_s21 = sshll.u32 %s1288_s17, 4 }
  0x37   : > { %p1341_p7 = pnand %p1609_p2, %p1608_p1  ;;  %s1350_s20 = scalar_lea.hbm %s1588_s1, %s1611_s19 }
  0x38   : > { %s285_s18 = scalar_lea.vmem [#allocation5], %s1612_s21  ;;  %s282_s22 = scalar_lea.sflag [#allocation6], %s1288_s17 }
  0x39   : > { %s1610_s12 = scalar_select %p1341_p7, 1, 0 }
  0x3a   : > { %s295_s0 = sshll.u32 %s285_s18, 4  ;;  %s1054_s30 = scalar_lea.hbm %s1350_s20, 256  ;;  %s296_s0 = int_to_ptr.vmem [resolvable:$true] %s295_s0 }
  0x3b   : > { %p1055_p9 = scmp.ne.s32.totalorder %s1350_s20, %s1054_s30  ;;  %s1059_s19 = scalar_lea.hbm %s1588_s1, 512 }
  0x3c   : > { %p1060_p3 = scmp.lt.u32.totalorder %s1350_s20, %s1588_s1  ;;  %p1061_p6 = scmp.lt.u32.totalorder %s1059_s19, %s1054_s30 }
  0x3d   : > { %p1057_p11 = pnand %p1055_p9, %p1026_p5  ;;  %p1063_p10 = scmp.lt.u32.totalorder %s1054_s30, %s1350_s20 }
  0x3e   : > { %p1062_p4 = por %p1061_p6, %p1060_p3 }
  0x3f   : > { %p1058_p13 = pneg %p1057_p11 }
  0x40   : > { %p1064_p12 = por %p1063_p10, %p1062_p4 }
  0x42   : > { %p1065_p1 = pnand %p1064_p12, %p1058_p13 }
  0x44   : > { %1068 = shalt.err (!%p1065_p1)
}
  0x45   : > { %s1069_s17 = scalar_lea.vmem %s296_s0, 256  ;;  %s1173_s21 = smov [#allocation5]  }
  0x46   : > { %p1070_p2 = scmp.ne.s32.totalorder %s296_s0, %s1069_s17  ;;  %s1074_s9 = sshll.u32 %s1173_s21, 4  ;;  %s1075_s9 = int_to_ptr.vmem [resolvable:$false] %s1074_s9 }
  0x47   : > { %s1076_s18 = scalar_lea.vmem %s1075_s9, 512  ;;  %p1077_p8 = scmp.lt.s32.totalorder %s296_s0, %s1075_s9 }
  0x48   : > { %p1072_p9 = pnand %p1070_p2, %p1026_p5  ;;  %p1078_p7 = scmp.lt.s32.totalorder %s1076_s18, %s1069_s17 }
  0x4a   : > { %p1073_p11 = pneg %p1072_p9  ;;  %p1079_p3 = por %p1078_p7, %p1077_p8 }
  0x4c   : > { %p1080_p6 = pnand %p1079_p3, %p1073_p11 }
  0x4e   : > { %1083 = shalt.err (!%p1080_p6)
}
  0x4f   : > { %935 = dma.hbm_to_vmem [thread:$0]  (!%p1305_p0), %s1350_s20, 256, %s296_s0, %s282_s22  }
  0x50   : > { %p1613_p13 = scmp.ne.s32.totalorder %s1610_s12, 0 }
  0x51   : > { %s1377_s30 = sand.u32 (!%p1613_p13), 1, %s1154_s25   ;;  %p1614_p8 = scmp.ne.s32.totalorder (!%p1613_p13), %s1603_s13, 0 }
  0x52   : > { %304 = sbr.rel (%p1613_p13) target bundleno = 330 (0x14a), region = 48  ;;  %s1380_s10 = sshll.u32 (!%p1613_p13), %s1377_s30, 4 }
  0x53   : > { %s307_s19 = scalar_lea.sflag (!%p1613_p13), [#allocation3], %s1377_s30  ;;  %s310_s11 = scalar_lea.vmem (!%p1613_p13), [#allocation2], %s1380_s10 }
  0x59   : > { %1137 = dma.done.wait (%p1614_p8), %s307_s19, 256  }
  0x5a   : > { %1139 = vsyncadd (%p1614_p8), %s307_s19, 4294967040  ;;  %s316_s0 = scalar_lea.sflag [#allocation6], %s1377_s30  ;;  %s319_s8 = scalar_lea.vmem [#allocation5], %s1380_s10 }
  0x5b   : > { %1141 = dma.done.wait (%p1614_p8), %s316_s0, 256  }
  0x5c   : > { %1143 = vsyncadd (%p1614_p8), %s316_s0, 4294967040  ;;  %v1174_v0 = vmov 0   ;;  %v363_v1 = vld [vmem:[%s1590_s3] sm:$0xff]  ;;  %v1175_v4 = vmov 1   ;;  %v1176_v5 = vmov 2   ;;  %v1177_v6 = vmov 3  }
  0x5d   : > { %999 = vset.pattern.permute.xlu1 %v1174_v0  ;;  %998 = vset.pattern.permute.xlu0 %v1174_v0  ;;  %v362_v2 = vld [vmem:[%s1589_s2] sm:$0xff]  ;;  %v1178_v7 = vmov 4   ;;  %v1179_v8 = vmov 6   ;;  %v1180_v9 = vmov 5   ;;  %v1181_v10 = vmov 7   ;;  %v1417_v16 = vld [vmem:[%s310_s11 + $0x8] sm:$0xff] }
  0x5e   : > { %390 = vperm.xlu1 %999, %v363_v1   ;;  %373 = vperm.xlu0 %998, %v362_v2   ;;  %v365_v3 = vld [vmem:[%s1591_s4] sm:$0xff]  ;;  %v376_v13 = vlaneseq  ;;  %v1432_v21 = vld [vmem:[%s319_s8 + $0x8] sm:$0xff]  ;;  %s354_s0 = scalar_lea.vmem [#allocation7], %s1380_s10  ;;  %p1615_p5 = scmp.ne.s32.totalorder %s1604_s14, 0 }
  0x5f   : > { %v364_v11 = vld [vmem:[%s1592_s5] sm:$0xff]  ;;  %s1182_s23 = smov [#allocation7]  }
  0x60   : > { %v631_v12 = vld [vmem:[%s1593_s6] sm:$0xff]  ;;  %v1409_v14 = vshrl.u32 %v376_v13, 7  ;;  %s1088_s17 = sshll.u32 %s1182_s23, 4  ;;  %s1089_s17 = int_to_ptr.vmem [resolvable:$false] %s1088_s17 }
  0x61   : > { %v1413_v15 = vld [vmem:[%s310_s11] sm:$0xff]  ;;  %s922_s11 = sshll.u32 %s1162_s27, 8  ;;  %s775_s27 = scalar_lea.sflag [#allocation4], %s1377_s30 }
  0x62   : > { %1000 = vset.pattern.permute.xlu1 %v1175_v4  ;;  %368 = vperm.xlu0 %998, %v365_v3   ;;  %v1420_v17 = vsub.s32 0, %v1409_v14  ;;  %v1428_v20 = vld [vmem:[%s319_s8] sm:$0xff]  ;;  %v1435_v22 = vsub.s32 1, %v1409_v14  ;;  %v1446_v31 = vsub.s32 2, %v1409_v14  ;;  %v1457_v49 = vsub.s32 3, %v1409_v14  ;;  %s791_s8 = sshll.u32 %s354_s0, 4  ;;  %s1538_s22 = scalar_lea.hbm %s1594_s7, %s922_s11  ;;  %s1540_s8 = int_to_ptr.vmem [resolvable:$true] %s791_s8 }
  0x63   : > { %406 = vperm.xlu1 %1000, %v362_v2   ;;  %s1084_s10 = scalar_lea.vmem %s1540_s8, 256  ;;  %s1090_s21 = scalar_lea.vmem %s1089_s17, 512 }
  0x64   : > { %v379_v18 = vrot.slane %v1413_v15, %v1420_v17  ;;  %v383_v19 = vrot.slane %v1417_v16, %v1420_v17  ;;  %v396_v25 = vrot.slane %v1428_v20, %v1420_v17  ;;  %v400_v26 = vrot.slane %v1432_v21, %v1420_v17  ;;  %p1085_p0 = scmp.ne.s32.totalorder %s1540_s8, %s1084_s10  ;;  %p1091_p10 = scmp.lt.s32.totalorder %s1540_s8, %s1089_s17 }
  0x65   : > { %v412_v29 = vrot.slane %v1413_v15, %v1435_v22  ;;  %v416_v30 = vrot.slane %v1417_v16, %v1435_v22  ;;  %v428_v40 = vrot.slane %v1428_v20, %v1435_v22  ;;  %v432_v41 = vrot.slane %v1432_v21, %v1435_v22  ;;  %p1092_p12 = scmp.lt.s32.totalorder %s1090_s21, %s1084_s10 }
  0x66   : > { %1001 = vset.pattern.permute.xlu0 %v1175_v4  ;;  %v444_v44 = vrot.slane %v1413_v15, %v1446_v31  ;;  %v448_v45 = vrot.slane %v1417_v16, %v1446_v31  ;;  %v460_v55 = vrot.slane %v1428_v20, %v1446_v31  ;;  %v464_v56 = vrot.slane %v1432_v21, %v1446_v31  ;;  %p1086_p7 = pnand %p1085_p0, %p1615_p5 }
  0x67   : > { %1002 = vset.pattern.permute.xlu1 %v1176_v5  ;;  %422 = vperm.xlu0 %1001, %v363_v1   ;;  %v476_v59 = vrot.slane %v1413_v15, %v1457_v49  ;;  %v480_v60 = vrot.slane %v1417_v16, %v1457_v49  ;;  %v492_v3 = vrot.slane %v1428_v20, %v1457_v49  ;;  %p1093_p1 = por %p1092_p12, %p1091_p10 }
  0x68   : > { %438 = vperm.xlu1 %1002, %v362_v2   ;;  %p1087_p4 = pneg %p1086_p7 }
  0x6a   : > { %p1094_p2 = pnand %p1093_p1, %p1087_p4 }
  0x6b   : > { %1003 = vset.pattern.permute.xlu0 %v1177_v6 }
  0x6c   : > { %454 = vperm.xlu1 %1002, %v363_v1   ;;  %470 = vperm.xlu0 %1003, %v362_v2  }
  0x70   : > { %1004 = vset.pattern.permute.xlu1 %v1177_v6  ;;  %1006 = vset.pattern.permute.xlu0 %v1178_v7 }
  0x71   : > { %486 = vperm.xlu1 %1004, %v363_v1   ;;  %518 = vperm.xlu0 %1006, %v363_v1  }
  0x75   : > { %1005 = vset.pattern.permute.xlu1 %v1178_v7  ;;  %1008 = vset.pattern.permute.xlu0 %v1179_v8 }
  0x76   : > { %502 = vperm.xlu1 %1005, %v362_v2   ;;  %566 = vperm.xlu0 %1008, %v362_v2  }
  0x7a   : > { %1007 = vset.pattern.permute.xlu1 %v1180_v9  ;;  %1011 = vset.pattern.permute.xlu0 %v1181_v10 }
  0x7b   : > { %534 = vperm.xlu1 %1007, %v362_v2   ;;  %614 = vperm.xlu0 %1011, %v363_v1  }
  0x7f   : > { %550 = vperm.xlu1 %1007, %v363_v1   ;;  %1013 = vset.pattern.permute.xlu0 %v1175_v4  ;;  %v496_v4 = vrot.slane %v1432_v21, %v1457_v49 }
  0x80   : > { %655 = vperm.xlu0 %1013, %v364_v11  }
  0x83   : > { %1009 = vset.pattern.permute.xlu1 %v1179_v8 }
  0x84   : > { %582 = vperm.xlu1 %1009, %v363_v1   ;;  %1016 = vset.pattern.permute.xlu0 %v1178_v7 }
  0x85   : > { %703 = vperm.xlu0 %1016, %v364_v11  }
  0x88   : > { %1010 = vset.pattern.permute.xlu1 %v1181_v10 }
  0x89   : > { %598 = vperm.xlu1 %1010, %v362_v2   ;;  %1019 = vset.pattern.permute.xlu0 %v1181_v10 }
  0x8a   : > { %751 = vperm.xlu0 %1019, %v364_v11  }
  0x8d   : > { %1012 = vset.pattern.permute.xlu1 %v1174_v0 }
  0x8e   : > { %639 = vperm.xlu1 %1012, %v364_v11  }
  0x92   : > { %634 = vperm.xlu1 %1012, %v631_v12  }
  0x96   : > { %1014 = vset.pattern.permute.xlu1 %v1176_v5  ;;  %v1472_v5 = vsub.s32 4, %v1409_v14 }
  0x97   : > { %671 = vperm.xlu1 %1014, %v364_v11  }
  0x98   : > { %v512_v12 = vrot.slane %v1417_v16, %v1472_v5 }
  0x9b   : > { %1015 = vset.pattern.permute.xlu1 %v1177_v6 }
  0x9c   : > { %687 = vperm.xlu1 %1015, %v364_v11  }
  0xa0   : > { %1017 = vset.pattern.permute.xlu1 %v1180_v9 }
  0xa1   : > { %719 = vperm.xlu1 %1017, %v364_v11  }
  0xa5   : > { %1018 = vset.pattern.permute.xlu1 %v1179_v8 }
  0xa6   : > { %735 = vperm.xlu1 %1018, %v364_v11   ;;  %v508_v11 = vrot.slane %v1413_v15, %v1472_v5 }
  0xdd   : > { %v391_v23 = vpop.permute.xlu1 %390  ;;  %v374_v24 = vpop.permute.xlu0 %373 }
  0xde   : > { %v384_v27 = vmul.f32 %v379_v18, %v374_v24  ;;  %v385_v28 = vmul.f32 %v383_v19, %v374_v24  ;;  %v401_v33 = vmul.f32 %v396_v25, %v391_v23  ;;  %v402_v34 = vmul.f32 %v400_v26, %v391_v23 }
  0xdf   : > { %v524_v24 = vrot.slane %v1428_v20, %v1472_v5  ;;  %v528_v25 = vrot.slane %v1432_v21, %v1472_v5  ;;  %v1483_v26 = vsub.s32 5, %v1409_v14 }
  0xe1   : > { %v369_v32 = vpop.permute.xlu0 %368 }
  0xe2   : > { %v386_v35 = vadd.f32 %v384_v27, %v369_v32  ;;  %v387_v36 = vadd.f32 %v385_v28, %v369_v32  ;;  %v407_v37 = vpop.permute.xlu1 %406 }
  0xe3   : > { %v417_v38 = vmul.f32 %v412_v29, %v407_v37  ;;  %v418_v39 = vmul.f32 %v416_v30, %v407_v37  ;;  %v544_v37 = vrot.slane %v1417_v16, %v1483_v26 }
  0xe4   : > { %v403_v42 = vadd.f32 %v401_v33, %v386_v35  ;;  %v404_v43 = vadd.f32 %v402_v34, %v387_v36  ;;  %v540_v36 = vrot.slane %v1413_v15, %v1483_v26 }
  0xe6   : > { %v419_v46 = vadd.f32 %v417_v38, %v403_v42  ;;  %v420_v47 = vadd.f32 %v418_v39, %v404_v43  ;;  %v423_v48 = vpop.permute.xlu0 %422  ;;  %v556_v42 = vrot.slane %v1428_v20, %v1483_v26  ;;  %v560_v43 = vrot.slane %v1432_v21, %v1483_v26 }
  0xe7   : > { %v433_v50 = vmul.f32 %v428_v40, %v423_v48  ;;  %v434_v51 = vmul.f32 %v432_v41, %v423_v48  ;;  %v439_v52 = vpop.permute.xlu1 %438  ;;  %v1490_v40 = vsub.s32 6, %v1409_v14 }
  0xe8   : > { %v449_v53 = vmul.f32 %v444_v44, %v439_v52  ;;  %v450_v54 = vmul.f32 %v448_v45, %v439_v52 }
  0xe9   : > { %v435_v57 = vadd.f32 %v433_v50, %v419_v46  ;;  %v436_v58 = vadd.f32 %v434_v51, %v420_v47  ;;  %v572_v48 = vrot.slane %v1413_v15, %v1490_v40  ;;  %v576_v50 = vrot.slane %v1417_v16, %v1490_v40 }
  0xeb   : > { %v451_v61 = vadd.f32 %v449_v53, %v435_v57  ;;  %v452_v62 = vadd.f32 %v450_v54, %v436_v58  ;;  %v455_v63 = vpop.permute.xlu1 %454  ;;  %v471_v0 = vpop.permute.xlu0 %470  ;;  %v588_v57 = vrot.slane %v1428_v20, %v1490_v40  ;;  %v592_v58 = vrot.slane %v1432_v21, %v1490_v40 }
  0xec   : > { %v465_v1 = vmul.f32 %v460_v55, %v455_v63  ;;  %v466_v2 = vmul.f32 %v464_v56, %v455_v63  ;;  %v481_v8 = vmul.f32 %v476_v59, %v471_v0  ;;  %v482_v9 = vmul.f32 %v480_v60, %v471_v0 }
  0xed   : > { %v1505_v59 = vsub.s32 7, %v1409_v14 }
  0xee   : > { %v467_v6 = vadd.f32 %v465_v1, %v451_v61  ;;  %v468_v7 = vadd.f32 %v466_v2, %v452_v62 }
  0xef   : > { %v620_v1 = vrot.slane %v1428_v20, %v1505_v59  ;;  %v624_v2 = vrot.slane %v1432_v21, %v1505_v59 }
  0xf0   : > { %v487_v10 = vpop.permute.xlu1 %486  ;;  %v483_v13 = vadd.f32 %v481_v8, %v467_v6  ;;  %v484_v18 = vadd.f32 %v482_v9, %v468_v7  ;;  %v519_v27 = vpop.permute.xlu0 %518 }
  0xf1   : > { %v497_v19 = vmul.f32 %v492_v3, %v487_v10  ;;  %v498_v23 = vmul.f32 %v496_v4, %v487_v10  ;;  %v529_v34 = vmul.f32 %v524_v24, %v519_v27  ;;  %v530_v35 = vmul.f32 %v528_v25, %v519_v27 }
  0xf2   : > { %v604_v3 = vrot.slane %v1413_v15, %v1505_v59  ;;  %v608_v4 = vrot.slane %v1417_v16, %v1505_v59 }
  0xf3   : > { %v499_v29 = vadd.f32 %v497_v19, %v483_v13  ;;  %v500_v30 = vadd.f32 %v498_v23, %v484_v18 }
  0xf5   : > { %v503_v28 = vpop.permute.xlu1 %502  ;;  %v567_v52 = vpop.permute.xlu0 %566 }
  0xf6   : > { %v513_v32 = vmul.f32 %v508_v11, %v503_v28  ;;  %v514_v33 = vmul.f32 %v512_v12, %v503_v28  ;;  %v577_v62 = vmul.f32 %v572_v48, %v567_v52  ;;  %v578_v63 = vmul.f32 %v576_v50, %v567_v52 }
  0xf8   : > { %v515_v38 = vadd.f32 %v513_v32, %v499_v29  ;;  %v516_v39 = vadd.f32 %v514_v33, %v500_v30 }
  0xfa   : > { %v535_v41 = vpop.permute.xlu1 %534  ;;  %v531_v44 = vadd.f32 %v529_v34, %v515_v38  ;;  %v532_v45 = vadd.f32 %v530_v35, %v516_v39  ;;  %v615_v9 = vpop.permute.xlu0 %614 }
  0xfb   : > { %v545_v46 = vmul.f32 %v540_v36, %v535_v41  ;;  %v546_v47 = vmul.f32 %v544_v37, %v535_v41  ;;  %v625_v10 = vmul.f32 %v620_v1, %v615_v9  ;;  %v626_v11 = vmul.f32 %v624_v2, %v615_v9 }
  0xfd   : > { %v547_v53 = vadd.f32 %v545_v46, %v531_v44  ;;  %v548_v54 = vadd.f32 %v546_v47, %v532_v45 }
  0xfe   : > { %v551_v51 = vpop.permute.xlu1 %550 }
  0xff   : > { %v561_v55 = vmul.f32 %v556_v42, %v551_v51  ;;  %v562_v56 = vmul.f32 %v560_v43, %v551_v51  ;;  %v656_v38 = vpop.permute.xlu0 %655 }
 0x101   : > { %v563_v60 = vadd.f32 %v561_v55, %v547_v53  ;;  %v564_v61 = vadd.f32 %v562_v56, %v548_v54 }
 0x103   : > { %v583_v0 = vpop.permute.xlu1 %582  ;;  %v579_v6 = vadd.f32 %v577_v62, %v563_v60  ;;  %v580_v14 = vadd.f32 %v578_v63, %v564_v61 }
 0x104   : > { %v593_v7 = vmul.f32 %v588_v57, %v583_v0  ;;  %v594_v8 = vmul.f32 %v592_v58, %v583_v0 }
 0x106   : > { %v595_v13 = vadd.f32 %v593_v7, %v579_v6  ;;  %v596_v18 = vadd.f32 %v594_v8, %v580_v14 }
 0x108   : > { %v599_v12 = vpop.permute.xlu1 %598 }
 0x109   : > { %v609_v20 = vmul.f32 %v604_v3, %v599_v12  ;;  %v610_v19 = vmul.f32 %v608_v4, %v599_v12 }
 0x10b   : > { %v611_v23 = vadd.f32 %v609_v20, %v595_v13  ;;  %v612_v21 = vadd.f32 %v610_v19, %v596_v18 }
 0x10d   : > { %v627_v24 = vadd.f32 %v625_v10, %v611_v23  ;;  %v628_v25 = vadd.f32 %v626_v11, %v612_v21  ;;  %v640_v27 = vpop.permute.xlu1 %639 }
 0x10f   : > { %v629_v28 = vmax.f32 %v627_v24, 0.0  ;;  %v630_v29 = vmax.f32 %v628_v25, 0.0 }
 0x111   : > { %v645_v30 = vrot.slane %v629_v28, %v1420_v17  ;;  %v649_v32 = vrot.slane %v630_v29, %v1420_v17  ;;  %v635_v33 = vpop.permute.xlu1 %634  ;;  %v661_v34 = vrot.slane %v629_v28, %v1435_v22  ;;  %v665_v35 = vrot.slane %v630_v29, %v1435_v22 }
 0x112   : > { %v677_v45 = vrot.slane %v629_v28, %v1446_v31  ;;  %v681_v46 = vrot.slane %v630_v29, %v1446_v31  ;;  %v693_v51 = vrot.slane %v629_v28, %v1457_v49  ;;  %v697_v22 = vrot.slane %v630_v29, %v1457_v49  ;;  %v704_v31 = vpop.permute.xlu0 %703 }
 0x113   : > { %v650_v36 = vmul.f32 %v645_v30, %v640_v27  ;;  %v651_v37 = vmul.f32 %v649_v32, %v640_v27  ;;  %v666_v42 = vmul.f32 %v661_v34, %v656_v38  ;;  %v667_v43 = vmul.f32 %v665_v35, %v656_v38 }
 0x114   : > { %v709_v52 = vrot.slane %v629_v28, %v1472_v5  ;;  %v713_v53 = vrot.slane %v630_v29, %v1472_v5  ;;  %v725_v1 = vrot.slane %v629_v28, %v1483_v26  ;;  %v729_v2 = vrot.slane %v630_v29, %v1483_v26 }
 0x115   : > { %v652_v39 = vadd.f32 %v650_v36, %v635_v33  ;;  %v653_v41 = vadd.f32 %v651_v37, %v635_v33  ;;  %v757_v5 = vrot.slane %v629_v28, %v1505_v59  ;;  %v761_v14 = vrot.slane %v630_v29, %v1505_v59 }
 0x116   : > { %v672_v44 = vpop.permute.xlu1 %671  ;;  %v714_v62 = vmul.f32 %v709_v52, %v704_v31  ;;  %v715_v63 = vmul.f32 %v713_v53, %v704_v31  ;;  %v741_v7 = vrot.slane %v629_v28, %v1490_v40  ;;  %v745_v8 = vrot.slane %v630_v29, %v1490_v40  ;;  %v752_v9 = vpop.permute.xlu0 %751 }
 0x117   : > { %v668_v47 = vadd.f32 %v666_v42, %v652_v39  ;;  %v669_v48 = vadd.f32 %v667_v43, %v653_v41  ;;  %v682_v17 = vmul.f32 %v677_v45, %v672_v44  ;;  %v683_v50 = vmul.f32 %v681_v46, %v672_v44 }
 0x118   : > { %v762_v18 = vmul.f32 %v757_v5, %v752_v9  ;;  %v763_v20 = vmul.f32 %v761_v14, %v752_v9 }
 0x119   : > { %v684_v55 = vadd.f32 %v682_v17, %v668_v47  ;;  %v685_v56 = vadd.f32 %v683_v50, %v669_v48 }
 0x11b   : > { %v688_v54 = vpop.permute.xlu1 %687 }
 0x11c   : > { %v698_v57 = vmul.f32 %v693_v51, %v688_v54  ;;  %v699_v58 = vmul.f32 %v697_v22, %v688_v54 }
 0x11e   : > { %v700_v60 = vadd.f32 %v698_v57, %v684_v55  ;;  %v701_v61 = vadd.f32 %v699_v58, %v685_v56 }
 0x120   : > { %v720_v0 = vpop.permute.xlu1 %719  ;;  %v716_v49 = vadd.f32 %v714_v62, %v700_v60  ;;  %v717_v3 = vadd.f32 %v715_v63, %v701_v61 }
 0x121   : > { %v730_v4 = vmul.f32 %v725_v1, %v720_v0  ;;  %v731_v6 = vmul.f32 %v729_v2, %v720_v0 }
 0x123   : > { %v732_v11 = vadd.f32 %v730_v4, %v716_v49  ;;  %v733_v12 = vadd.f32 %v731_v6, %v717_v3 }
 0x125   : > { %v736_v10 = vpop.permute.xlu1 %735 }
 0x126   : > { %v746_v13 = vmul.f32 %v741_v7, %v736_v10  ;;  %v747_v26 = vmul.f32 %v745_v8, %v736_v10 }
 0x128   : > { %v748_v19 = vadd.f32 %v746_v13, %v732_v11  ;;  %v749_v23 = vadd.f32 %v747_v26, %v733_v12 }
 0x12a   : > { %v764_v21 = vadd.f32 %v762_v18, %v748_v19  ;;  %v765_v24 = vadd.f32 %v763_v20, %v749_v23 }
 0x12c   : > { %1020 = vtanh.f32 %v764_v21 }
 0x12d   : > { %1022 = vtanh.f32 %v765_v24 }
 0x136   : > { %v1021_v59 = vpop.eup %1020 }
 0x137   : > { %v1023_v40 = vpop.eup %1022  ;;  %v768_v25 = vadd.f32 1.0, %v1021_v59 }
 0x138   : > { %v769_v27 = vadd.f32 1.0, %v1023_v40 }
 0x139   : > { %v770_v28 = vmul.f32 %v768_v25, %v1413_v15 }
 0x13a   : > { %v771_v29 = vmul.f32 %v769_v27, %v1417_v16 }
 0x13b   : > { %772 = vst [vmem:[%s354_s0] sm:$0xff] %v770_v28 }
 0x13c   : > { %773 = vst [vmem:[%s354_s0 + $0x8] sm:$0xff] %v771_v29 }
 0x13d   : > { %1097 = shalt.err (!%p1094_p2)
}
 0x13e   : > { %s1098_s30 = scalar_lea.hbm %s1538_s22, 256  ;;  %s1102_s18 = scalar_lea.hbm %s1594_s7, 512 }
 0x13f   : > { %p1099_p9 = scmp.ne.s32.totalorder %s1538_s22, %s1098_s30  ;;  %p1103_p6 = scmp.lt.u32.totalorder %s1538_s22, %s1594_s7 }
 0x140   : > { %p1104_p13 = scmp.lt.u32.totalorder %s1102_s18, %s1098_s30  ;;  %p1106_p0 = scmp.lt.u32.totalorder %s1098_s30, %s1538_s22 }
 0x141   : > { %p1100_p11 = pnand %p1099_p9, %p1615_p5 }
 0x142   : > { %p1105_p8 = por %p1104_p13, %p1103_p6 }
 0x143   : > { %p1101_p3 = pneg %p1100_p11 }
 0x144   : > { %p1107_p7 = por %p1106_p0, %p1105_p8 }
 0x146   : > { %p1108_p4 = pnand %p1107_p7, %p1101_p3 }
 0x148   : > { %1111 = shalt.err (!%p1108_p4)
}
 0x149   : > { %927 = dma.vmem_to_hbm [thread:$0]  (%p1615_p5), %s1540_s8, 256, %s1538_s22, %s775_s27  }
 0x14a PF: > { %s803_s0 = sand.u32 1, %s1150_s24   ;;  %p1616_p10 = scmp.ne.s32.totalorder %s1605_s16, 0 }
 0x14b   : > { %p1617_p12 = scmp.ge.s32.totalorder %s1170_s29, 2  ;;  %s804_s12 = scalar_lea.sflag [#allocation4], %s803_s0 }
 0x14d   : > { %p937_p1 = pnand %p1617_p12, %p1616_p10 }
 0x14f   : > { %1145 = dma.done.wait (!%p937_p1), %s804_s12, 256  }
 0x150   : > { %1147 = vsyncadd (!%p937_p1), %s804_s12, 4294967040  ;;  %s26_s29 = sadd.s32 1, %s1170_s29   ;;  %s1618_s14 = sld [smem:[#allocation11_spill]] }
 0x151   : > { %p23_p2 = scmp.ge.s32.totalorder %s26_s29, 4   ;;  %s1619_s24 = smov %s1154_s25 }
 0x152   : > { %s1620_s25 = smov %s1158_s26  ;;  %s1621_s26 = smov %s1279_s15 }
 0x153   : > { %s1622_s27 = smov %s1166_s28  ;;  %25 = sbr.rel (!%p23_p2) target bundleno = 10 (0xa), region = 106 }
 0x156   : > { %s1623_s28 = smov %s1618_s14 }
 0x15a   :  { %809 = vsyncpa [#allocation3], 1 }
 0x15b   :  { %811 = vsyncpa [#allocation3 + $0x1], 1 }
 0x15c   :  { %812 = vsyncpa [#allocation6], 1 }
 0x15d   :  { %814 = vsyncpa [#allocation6 + $0x1], 1 }
 0x15e   :  { %815 = vsyncpa [#allocation4], 1 }
 0x15f   :  { %817 = vsyncpa [#allocation4 + $0x1], 1 }

</bundles_post_ra>
